<compile_context>
chip_gen: v5e
topology: v5e:2x2
jax: 0.10.0
libtpu: 0.0.40
codegen_flags: <defaults>
</compile_context>

<pallas_src>
import functools

import jax
import jax.numpy as jnp
from jax import lax
from jax.experimental import pallas as pl
from jax.experimental.pallas import tpu as pltpu


def _round_up(x, m):
    return (x + m - 1) // m * m


def _vmem_capacity_bytes():
    try:
        return int(pltpu.get_tpu_info().vmem_capacity_bytes)
    except Exception:
        return 64 * 2 ** 20  # conservative default: v7x per-TensorCore


# ---------------------------------------------------------------------------
# Kernel bodies
# ---------------------------------------------------------------------------


def _mlp_chunk(xc, wi_blk, bi_blk, wo_blk, wo_dtype):
    """swish(xc @ wi + bi) @ wo for one d_ext chunk; f32 accumulation on MXU."""
    h = jnp.dot(xc, wi_blk, preferred_element_type=jnp.float32) + bi_blk
    h = h * jax.nn.sigmoid(h)                       # swish / SiLU in f32
    return jnp.dot(h.astype(wo_dtype), wo_blk, preferred_element_type=jnp.float32)


def _layernorm_residual(x, y, g, b, eps):
    """One-pass LayerNorm over the lane axis + residual add, all in f32."""
    mean = jnp.mean(y, axis=-1, keepdims=True)
    var = jnp.maximum(jnp.mean(y * y, axis=-1, keepdims=True) - mean * mean, 0.0)
    ln = (y - mean) * jax.lax.rsqrt(var + eps) * g + b
    return x.astype(jnp.float32) + ln


def _ff_resident_kernel(x_ref, wi_ref, bi_ref, wo_ref, bo_ref, g_ref, b_ref,
                        o_ref, *, eps, ext_chunk, n_chunks):
    """Grid = (row tiles,).  Weights / biases / LN params are whole-array VMEM refs."""
    x = x_ref[...]                                   # (tm, d_model), input dtype
    xc = x.astype(wi_ref.dtype)                      # bf16 LHS for the MXU

    if n_chunks == 1:
        y = _mlp_chunk(xc, wi_ref[...], bi_ref[...], wo_ref[...], wo_ref.dtype)
    else:
        def body(c, acc):
            off = pl.multiple_of(c * ext_chunk, ext_chunk)
            return acc + _mlp_chunk(
                xc,
                wi_ref[:, pl.ds(off, ext_chunk)],
                bi_ref[:, pl.ds(off, ext_chunk)],
                wo_ref[pl.ds(off, ext_chunk), :],
                wo_ref.dtype)

        y = lax.fori_loop(0, n_chunks, body,
                          jnp.zeros(o_ref.shape, jnp.float32),
                          unroll=min(n_chunks, 8))

    y = y + bo_ref[...]
    o_ref[...] = _layernorm_residual(x, y, g_ref[...], b_ref[...],
                                     eps).astype(o_ref.dtype)


def _ff_streamed_kernel(x_ref, wi_ref, bi_ref, wo_ref, bo_ref, g_ref, b_ref,
                        o_ref, acc_ref, *, eps):
    """Grid = (row tiles, d_ext chunks).  acc_ref is a (tm, d_model) f32 scratch."""
    k = pl.program_id(1)

    @pl.when(k == 0)
    def _():
        acc_ref[...] = jnp.zeros_like(acc_ref)

    x = x_ref[...]
    acc_ref[...] += _mlp_chunk(x.astype(wi_ref.dtype), wi_ref[...], bi_ref[...],
                               wo_ref[...], wo_ref.dtype)

    @pl.when(k == pl.num_programs(1) - 1)
    def _():
        y = acc_ref[...] + bo_ref[...]
        o_ref[...] = _layernorm_residual(x, y, g_ref[...], b_ref[...],
                                         eps).astype(o_ref.dtype)


# ---------------------------------------------------------------------------
# VMEM-aware planning
# ---------------------------------------------------------------------------


def _plan(M, d_model, d_ext, w_isz, x_isz, tm_req):
    """Pick mode (resident vs streamed), row tile and d_ext chunk from VMEM size."""
    cap = _vmem_capacity_bytes()
    budget = int(0.70 * cap)                         # leave 30% for Mosaic scratch

    # Row tile: full MXU-height tiles for large M; otherwise just cover M
    # (16-aligned for bf16 sublane packing) -- do not over-pad tiny problems.
    tm = tm_req if M >= tm_req else max(16, _round_up(M, 16))

    def resident_fp(tm_, chunk):
        return (2 * d_model * d_ext * w_isz          # wi + wo, single VMEM copy
                + 4 * tm_ * d_model * x_isz          # x + out, double buffered
                + tm_ * d_model * 4                  # f32 y accumulator value
                + tm_ * chunk * (4 + w_isz)          # swish temp (f32 + bf16 copy)
                + (d_ext + 3 * d_model) * 4)         # biases / gamma / beta

    chunk_cands = [d_ext] + [c for c in (4096, 2048, 1024, 512, 256, 128)
                             if c < d_ext and d_ext % c == 0]
    for tm_try in dict.fromkeys((tm, min(tm, 128))):
        for chunk in chunk_cands:
            est = resident_fp(tm_try, chunk)
            if est <= budget:
                return dict(mode="resident", tm=tm_try, ext_chunk=chunk,
                            n_chunks=d_ext // chunk, cap=cap, est=est)

    # Streamed fallback (weights do not fit in VMEM at all).
    def streamed_fp(tm_, tk_):
        return (4 * d_model * tk_ * w_isz            # wi + wo step tiles, 2x buffered
                + 4 * tm_ * d_model * x_isz
                + tm_ * d_model * 4                  # f32 accumulator scratch
                + tm_ * tk_ * (4 + w_isz)
                + (d_ext + 3 * d_model) * 4)

    tk_cands = [c for c in (2048, 1024, 512, 256, 128) if d_ext % c == 0] or [d_ext]
    tm_cands = [t for t in (512, 256, 128) if t <= _round_up(M, 16)] \
        or [max(16, _round_up(M, 16))]
    fallback = None
    for tm_s in tm_cands:
        for tk in tk_cands:
            est = streamed_fp(tm_s, tk)
            cand = dict(mode="streamed", tm=tm_s, ext_chunk=tk,
                        n_chunks=d_ext // tk, cap=cap, est=est)
            if est <= budget:
                return cand
            fallback = cand
    return fallback


def _vmem_limit_bytes(est, cap):
    # Planned footprint + 50% margin, floor 32 MiB, and keep >= 12 MiB of
    # physical headroom for Mosaic-internal scratch / semaphores.
    return int(min(max(est + est // 2, 32 * 2 ** 20), cap - 12 * 2 ** 20))


# ---------------------------------------------------------------------------
# pallas_call builders
# ---------------------------------------------------------------------------


def _build_resident_call(Mp, d_model, tm, ext_chunk, n_chunks, out_dtype, eps,
                         vmem_limit):
    kernel = functools.partial(_ff_resident_kernel, eps=eps,
                               ext_chunk=ext_chunk, n_chunks=n_chunks)
    # Whole-array VMEM operands: single copy, DMA'd from HBM exactly once.
    resident = pl.BlockSpec(memory_space=pltpu.MemorySpace.VMEM)
    return pl.pallas_call(
        kernel,
        out_shape=jax.ShapeDtypeStruct((Mp, d_model), out_dtype),
        grid_spec=pltpu.PrefetchScalarGridSpec(
            num_scalar_prefetch=0,
            grid=(Mp // tm,),
            in_specs=[
                pl.BlockSpec((tm, d_model), lambda i: (i, 0)),   # x row tiles
                resident,                                        # wi
                resident,                                        # wi bias
                resident,                                        # wo
                resident,                                        # wo bias
                resident,                                        # ln gamma
                resident,                                        # ln beta
            ],
            out_specs=pl.BlockSpec((tm, d_model), lambda i: (i, 0)),
        ),
        # Row axis is independent -> "parallel" so the grid can shard across
        # TensorCores (each core holds its own resident weight copy).
        compiler_params=pltpu.CompilerParams(
            dimension_semantics=("parallel",),
            vmem_limit_bytes=vmem_limit,
        ),
    )


def _build_streamed_call(Mp, d_model, tm, tk, nk, out_dtype, eps, vmem_limit):
    kernel = functools.partial(_ff_streamed_kernel, eps=eps)
    return pl.pallas_call(
        kernel,
        out_shape=jax.ShapeDtypeStruct((Mp, d_model), out_dtype),
        grid_spec=pltpu.PrefetchScalarGridSpec(
            num_scalar_prefetch=0,
            grid=(Mp // tm, nk),                     # rows parallel, d_ext reduction
            in_specs=[
                pl.BlockSpec((tm, d_model), lambda i, k: (i, 0)),   # x
                pl.BlockSpec((d_model, tk), lambda i, k: (0, k)),   # wi chunk
                pl.BlockSpec((1, tk), lambda i, k: (0, k)),         # wi bias chunk
                pl.BlockSpec((tk, d_model), lambda i, k: (k, 0)),   # wo chunk
                pl.BlockSpec((1, d_model), lambda i, k: (0, 0)),    # wo bias
                pl.BlockSpec((1, d_model), lambda i, k: (0, 0)),    # ln gamma
                pl.BlockSpec((1, d_model), lambda i, k: (0, 0)),    # ln beta
            ],
            out_specs=pl.BlockSpec((tm, d_model), lambda i, k: (i, 0)),
            scratch_shapes=[pltpu.VMEM((tm, d_model), jnp.float32)],
        ),
        compiler_params=pltpu.CompilerParams(
            dimension_semantics=("parallel", "arbitrary"),
            vmem_limit_bytes=vmem_limit,
        ),
    )


# ---------------------------------------------------------------------------
# Public wrapper
# ---------------------------------------------------------------------------


def gptsan_layer_dense_ff(hidden_states, wi_w, wi_b, wo_w, wo_b, ln_g, ln_b,
                          *, eps=1e-5, tm=256, compute_dtype=jnp.bfloat16,
                          force_streamed_tk=None):
    """hidden_states: [num_groups, tokens_per_group, d_model] -> same shape."""
    ng, tpg, d_model = hidden_states.shape
    d_ext = wi_w.shape[1]
    M = ng * tpg

    w_isz = jnp.dtype(compute_dtype).itemsize
    x_isz = jnp.dtype(hidden_states.dtype).itemsize

    if force_streamed_tk is not None:                # test hook for the streamed path
        tk = force_streamed_tk
        tm_eff = tm if M >= tm else max(16, _round_up(M, 16))
        est = (4 * d_model * tk * w_isz + 4 * tm_eff * d_model * x_isz
               + tm_eff * d_model * 4 + tm_eff * tk * (4 + w_isz)
               + (d_ext + 3 * d_model) * 4)
        plan = dict(mode="streamed", tm=tm_eff, ext_chunk=tk,
                    n_chunks=d_ext // tk, cap=_vmem_capacity_bytes(), est=est)
    else:
        plan = _plan(M, d_model, d_ext, w_isz, x_isz, tm)

    tm_eff = plan["tm"]
    Mp = _round_up(M, tm_eff)

    x2d = hidden_states.reshape(M, d_model)
    if Mp != M:
        x2d = jnp.pad(x2d, ((0, Mp - M), (0, 0)))

    # bf16 weights halve HBM traffic / VMEM residency and take the fast MXU
    # path; biases and LayerNorm params stay f32 (all elementwise math is f32).
    wi_c = wi_w.astype(compute_dtype)
    wo_c = wo_w.astype(compute_dtype)
    bi2d = wi_b.reshape(1, d_ext).astype(jnp.float32)
    bo2d = wo_b.reshape(1, d_model).astype(jnp.float32)
    g2d = ln_g.reshape(1, d_model).astype(jnp.float32)
    b2d = ln_b.reshape(1, d_model).astype(jnp.float32)

    vmem_limit = _vmem_limit_bytes(plan["est"], plan["cap"])

    if plan["mode"] == "resident":
        call = _build_resident_call(Mp, d_model, tm_eff, plan["ext_chunk"],
                                    plan["n_chunks"], hidden_states.dtype, eps,
                                    vmem_limit)
    else:
        call = _build_streamed_call(Mp, d_model, tm_eff, plan["ext_chunk"],
                                    plan["n_chunks"], hidden_states.dtype, eps,
                                    vmem_limit)

    out2d = call(x2d, wi_c, bi2d, wo_c, bo2d, g2d, b2d)
    return out2d[:M].reshape(ng, tpg, d_model)


# ---------------------------------------------------------------------------
# Pure-JAX reference + self-test
# ---------------------------------------------------------------------------


def _reference(hidden_states, wi_w, wi_b, wo_w, wo_b, ln_g, ln_b, *,
               eps=1e-5, compute_dtype=jnp.float32):
    x = hidden_states
    h = jnp.dot(x.astype(compute_dtype), wi_w.astype(compute_dtype),
                preferred_element_type=jnp.float32) + wi_b.astype(jnp.float32)
    h = h * jax.nn.sigmoid(h)
    y = jnp.dot(h.astype(compute_dtype), wo_w.astype(compute_dtype),
                preferred_element_type=jnp.float32) + wo_b.astype(jnp.float32)
    mean = jnp.mean(y, axis=-1, keepdims=True)
    var = jnp.mean((y - mean) ** 2, axis=-1, keepdims=True)
    ln = (y - mean) * jax.lax.rsqrt(var + eps) * ln_g + ln_b
    return x.astype(jnp.float32) + ln


if __name__ == "__main__":
    eps = 1e-5
    key = jax.random.PRNGKey(0)

    def make_case(k, ng, tpg, d_model, d_ext):
        kx, k1, k2, k3, k4, k5, k6 = jax.random.split(k, 7)
        x = jax.random.normal(kx, (ng, tpg, d_model), jnp.float32)
        wi_w = jax.random.normal(k1, (d_model, d_ext), jnp.float32) * 0.05
        wi_b = jax.random.normal(k2, (d_ext,), jnp.float32) * 0.05
        wo_w = jax.random.normal(k3, (d_ext, d_model), jnp.float32) * 0.05
        wo_b = jax.random.normal(k4, (d_model,), jnp.float32) * 0.05
        ln_g = 1.0 + 0.05 * jax.random.normal(k5, (d_model,), jnp.float32)
        ln_b = 0.05 * jax.random.normal(k6, (d_model,), jnp.float32)
        return x, wi_w, wi_b, wo_w, wo_b, ln_g, ln_b

    def check(out, args):
        out = jax.block_until_ready(out)
        assert out.shape == args[0].shape
        # Reference with the same bf16 matmul operands / f32 accumulation.
        ref_bf16 = _reference(*args, eps=eps, compute_dtype=jnp.bfloat16)
        assert jnp.allclose(out, ref_bf16, atol=1e-3, rtol=1e-3), \
            "mismatch vs bf16 reference"
        # Full-f32 reference (loose tolerance, semantics sanity check).
        ref_f32 = _reference(*args, eps=eps, compute_dtype=jnp.float32)
        assert jnp.allclose(out, ref_f32, atol=1e-1, rtol=1e-1), \
            "mismatch vs f32 reference"

    k1, k2 = jax.random.split(key)

    # Case 1: resident-weight path (1-D grid, in-kernel d_ext handling).
    args1 = make_case(k1, 2, 8, 32, 64)
    check(gptsan_layer_dense_ff(*args1, eps=eps), args1)

    # Case 2: streamed-weight fallback path (2-D grid + f32 accumulator),
    # forced so this code path also compiles and runs on small shapes.
    args2 = make_case(k2, 2, 16, 64, 256)
    check(gptsan_layer_dense_ff(*args2, eps=eps, force_streamed_tk=128), args2)

    print("KERNEL_OK")
</pallas_src>

<mosaic_0001>
module attributes {stable_mosaic.version = 11 : i64} {
  func.func @_ff_resident_kernel(%arg0: i32, %arg1: memref<16x32xf32, #tpu.memory_space<vmem>>, %arg2: memref<32x64xbf16, #tpu.memory_space<vmem>>, %arg3: memref<1x64xf32, #tpu.memory_space<vmem>>, %arg4: memref<64x32xbf16, #tpu.memory_space<vmem>>, %arg5: memref<1x32xf32, #tpu.memory_space<vmem>>, %arg6: memref<1x32xf32, #tpu.memory_space<vmem>>, %arg7: memref<1x32xf32, #tpu.memory_space<vmem>>, %arg8: memref<16x32xf32, #tpu.memory_space<vmem>>) attributes {dimension_semantics = [#tpu.dimension_semantics<parallel>], iteration_bounds = array<i64: 1>, scalar_prefetch = 0 : i64, scratch_operands = 0 : i64, tpu.core_type = #tpu.core_type<tc>, window_params = [{transform_indices = @transform_0, window_bounds = array<i64: 16, 32>}, {pipeline_mode = #tpu.pipeline_mode<synchronous>, transform_indices = @transform_1, window_bounds = array<i64: 32, 64>}, {pipeline_mode = #tpu.pipeline_mode<synchronous>, transform_indices = @transform_2, window_bounds = array<i64: 1, 64>}, {pipeline_mode = #tpu.pipeline_mode<synchronous>, transform_indices = @transform_3, window_bounds = array<i64: 64, 32>}, {pipeline_mode = #tpu.pipeline_mode<synchronous>, transform_indices = @transform_4, window_bounds = array<i64: 1, 32>}, {pipeline_mode = #tpu.pipeline_mode<synchronous>, transform_indices = @transform_5, window_bounds = array<i64: 1, 32>}, {pipeline_mode = #tpu.pipeline_mode<synchronous>, transform_indices = @transform_6, window_bounds = array<i64: 1, 32>}, {transform_indices = @transform_7, window_bounds = array<i64: 16, 32>}]} {
    %c0 = arith.constant 0 : index
    %c0_0 = arith.constant 0 : index
    %0 = vector.load %arg1[%c0, %c0_0] : memref<16x32xf32, #tpu.memory_space<vmem>>, vector<16x32xf32>
    %1 = arith.truncf %0 : vector<16x32xf32> to vector<16x32xbf16>
    %c0_1 = arith.constant 0 : index
    %c0_2 = arith.constant 0 : index
    %2 = vector.load %arg2[%c0_1, %c0_2] : memref<32x64xbf16, #tpu.memory_space<vmem>>, vector<32x64xbf16>
    %c0_3 = arith.constant 0 : index
    %c0_4 = arith.constant 0 : index
    %3 = vector.load %arg3[%c0_3, %c0_4] : memref<1x64xf32, #tpu.memory_space<vmem>>, vector<1x64xf32>
    %c0_5 = arith.constant 0 : index
    %c0_6 = arith.constant 0 : index
    %4 = vector.load %arg4[%c0_5, %c0_6] : memref<64x32xbf16, #tpu.memory_space<vmem>>, vector<64x32xbf16>
    %cst = arith.constant dense<0.000000e+00> : vector<16x64xf32>
    %5 = tpu.matmul %1, %2, %cst {dimension_numbers = #tpu.dot_dimension_numbers<[1], [0], [0], [1], [0, 0, 1, 1], [], []>} : vector<16x32xbf16>, vector<32x64xbf16>, vector<16x64xf32> -> vector<16x64xf32>
    %6 = vector.broadcast %3 : vector<1x64xf32> to vector<16x64xf32>
    %7 = arith.addf %5, %6 : vector<16x64xf32>
    %8 = arith.negf %7 : vector<16x64xf32>
    %9 = math.exp %8 : vector<16x64xf32>
    %cst_7 = arith.constant 1.000000e+00 : f32
    %10 = vector.broadcast %cst_7 : f32 to vector<16x64xf32>
    %11 = arith.addf %10, %9 : vector<16x64xf32>
    %12 = arith.divf %10, %11 : vector<16x64xf32>
    %13 = arith.mulf %7, %12 : vector<16x64xf32>
    %14 = arith.truncf %13 : vector<16x64xf32> to vector<16x64xbf16>
    %cst_8 = arith.constant dense<0.000000e+00> : vector<16x32xf32>
    %15 = tpu.matmul %14, %4, %cst_8 {dimension_numbers = #tpu.dot_dimension_numbers<[1], [0], [0], [1], [0, 0, 1, 1], [], []>} : vector<16x64xbf16>, vector<64x32xbf16>, vector<16x32xf32> -> vector<16x32xf32>
    %c0_9 = arith.constant 0 : index
    %c0_10 = arith.constant 0 : index
    %16 = vector.load %arg5[%c0_9, %c0_10] : memref<1x32xf32, #tpu.memory_space<vmem>>, vector<1x32xf32>
    %17 = vector.broadcast %16 : vector<1x32xf32> to vector<16x32xf32>
    %18 = arith.addf %15, %17 : vector<16x32xf32>
    %c0_11 = arith.constant 0 : index
    %c0_12 = arith.constant 0 : index
    %19 = vector.load %arg6[%c0_11, %c0_12] : memref<1x32xf32, #tpu.memory_space<vmem>>, vector<1x32xf32>
    %c0_13 = arith.constant 0 : index
    %c0_14 = arith.constant 0 : index
    %20 = vector.load %arg7[%c0_13, %c0_14] : memref<1x32xf32, #tpu.memory_space<vmem>>, vector<1x32xf32>
    %cst_15 = arith.constant dense<0.000000e+00> : vector<16xf32>
    %21 = vector.multi_reduction <add>, %18, %cst_15 [1] : vector<16x32xf32> to vector<16xf32>
    %22 = vector.shape_cast %21 : vector<16xf32> to vector<16x1xf32>
    %cst_16 = arith.constant 3.200000e+01 : f32
    %23 = vector.broadcast %cst_16 : f32 to vector<16x1xf32>
    %24 = arith.divf %22, %23 : vector<16x1xf32>
    %25 = arith.mulf %18, %18 : vector<16x32xf32>
    %cst_17 = arith.constant dense<0.000000e+00> : vector<16xf32>
    %26 = vector.multi_reduction <add>, %25, %cst_17 [1] : vector<16x32xf32> to vector<16xf32>
    %27 = vector.shape_cast %26 : vector<16xf32> to vector<16x1xf32>
    %cst_18 = arith.constant 3.200000e+01 : f32
    %28 = vector.broadcast %cst_18 : f32 to vector<16x1xf32>
    %29 = arith.divf %27, %28 : vector<16x1xf32>
    %30 = arith.mulf %24, %24 : vector<16x1xf32>
    %31 = arith.subf %29, %30 : vector<16x1xf32>
    %cst_19 = arith.constant 0.000000e+00 : f32
    %32 = vector.broadcast %cst_19 : f32 to vector<16x1xf32>
    %33 = arith.maximumf %31, %32 : vector<16x1xf32>
    %34 = vector.broadcast %24 : vector<16x1xf32> to vector<16x32xf32>
    %35 = arith.subf %18, %34 : vector<16x32xf32>
    %cst_20 = arith.constant 9.99999974E-6 : f32
    %36 = vector.broadcast %cst_20 : f32 to vector<16x1xf32>
    %37 = arith.addf %33, %36 : vector<16x1xf32>
    %38 = math.rsqrt %37 : vector<16x1xf32>
    %39 = vector.broadcast %38 : vector<16x1xf32> to vector<16x32xf32>
    %40 = arith.mulf %35, %39 : vector<16x32xf32>
    %41 = vector.broadcast %19 : vector<1x32xf32> to vector<16x32xf32>
    %42 = arith.mulf %40, %41 : vector<16x32xf32>
    %43 = vector.broadcast %20 : vector<1x32xf32> to vector<16x32xf32>
    %44 = arith.addf %42, %43 : vector<16x32xf32>
    %45 = arith.addf %0, %44 : vector<16x32xf32>
    %c0_21 = arith.constant 0 : index
    %c0_22 = arith.constant 0 : index
    %46 = vector.load %arg8[%c0_21, %c0_22] : memref<16x32xf32, #tpu.memory_space<vmem>>, vector<16x32xf32>
    tpu.vector_store %arg8[%c0_21, %c0_22], %45 {strides = array<i32>} : memref<16x32xf32, #tpu.memory_space<vmem>>, vector<16x32xf32>,
    return
  }
  func.func @transform_0(%arg0: i32) -> (i32, i32) {
    %c0_i32 = arith.constant 0 : i32
    %c0_i32_0 = arith.constant 0 : i32
    return %arg0, %c0_i32 : i32, i32
  }
  func.func @transform_1(%arg0: i32) -> (i32, i32) {
    %c0_i32 = arith.constant 0 : i32
    %c0_i32_0 = arith.constant 0 : i32
    %c0_i32_1 = arith.constant 0 : i32
    return %c0_i32, %c0_i32_0 : i32, i32
  }
  func.func @transform_2(%arg0: i32) -> (i32, i32) {
    %c0_i32 = arith.constant 0 : i32
    %c0_i32_0 = arith.constant 0 : i32
    %c0_i32_1 = arith.constant 0 : i32
    return %c0_i32, %c0_i32_0 : i32, i32
  }
  func.func @transform_3(%arg0: i32) -> (i32, i32) {
    %c0_i32 = arith.constant 0 : i32
    %c0_i32_0 = arith.constant 0 : i32
    %c0_i32_1 = arith.constant 0 : i32
    return %c0_i32, %c0_i32_0 : i32, i32
  }
  func.func @transform_4(%arg0: i32) -> (i32, i32) {
    %c0_i32 = arith.constant 0 : i32
    %c0_i32_0 = arith.constant 0 : i32
    %c0_i32_1 = arith.constant 0 : i32
    return %c0_i32, %c0_i32_0 : i32, i32
  }
  func.func @transform_5(%arg0: i32) -> (i32, i32) {
    %c0_i32 = arith.constant 0 : i32
    %c0_i32_0 = arith.constant 0 : i32
    %c0_i32_1 = arith.constant 0 : i32
    return %c0_i32, %c0_i32_0 : i32, i32
  }
  func.func @transform_6(%arg0: i32) -> (i32, i32) {
    %c0_i32 = arith.constant 0 : i32
    %c0_i32_0 = arith.constant 0 : i32
    %c0_i32_1 = arith.constant 0 : i32
    return %c0_i32, %c0_i32_0 : i32, i32
  }
  func.func @transform_7(%arg0: i32) -> (i32, i32) {
    %c0_i32 = arith.constant 0 : i32
    %c0_i32_0 = arith.constant 0 : i32
    return %arg0, %c0_i32 : i32, i32
  }
}

</mosaic_0001>

<bundles_post_ra>
// kernel: tpu_custom_call.1
= control target key start
LH: loop header
LB: loop body
LE: loop exit
PB: predicated region body
PF: predicated region fallthrough
CT: control target
= control target key end

     0   :  { %s441_s0 = inlined_call_operand.vmem [shape: f32[16,32], index: 0, kind: input, shape index: {}]   ;;  %s442_s1 = inlined_call_operand.vmem [shape: bf16[32,64], index: 1, kind: input, shape index: {}]   ;;  %s443_s2 = inlined_call_operand.vmem [shape: f32[1,64], index: 2, kind: input, shape index: {}]   ;;  %s444_s3 = inlined_call_operand.vmem [shape: bf16[64,32], index: 3, kind: input, shape index: {}]   ;;  %s445_s4 = inlined_call_operand.vmem [shape: f32[1,32], index: 4, kind: input, shape index: {}]   ;;  %s446_s5 = inlined_call_operand.vmem [shape: f32[1,32], index: 5, kind: input, shape index: {}]   ;;  %s447_s6 = inlined_call_operand.vmem [shape: f32[1,32], index: 6, kind: input, shape index: {}]   ;;  %s448_s7 = inlined_call_operand.hbm [shape: f32[16,32], index: 7, kind: output, shape index: {}]  }
   0x1   :  { %v284_v0 = vld [vmem:[%s442_s1 + $0x8] sm:$0xff]  ;;  %v283_v1 = vld [vmem:[%s442_s1] sm:$0xff] }
   0x2   :  { %v390_v2 = vld [vmem:[%s441_s0] sm:$0xff]  ;;  %v395_v3 = vld [vmem:[%s441_s0 + $0x8] sm:$0xff]  ;;  %69 = vmatpush.bf16.msra.mxu0 %v284_v0 }
   0x3   :  { %12 = vsyncpa [#allocation3], 0  ;;  %v30_v4 = vpack.c.bf16 %v395_v3, %v390_v2  ;;  %vm59_vm0 = vcmask 261120   ;;  %v288_v5 = vld [vmem:[%s444_s3 + $0x18] sm:$0xff]  ;;  %v293_v6 = vld [vmem:[%s443_s2] ss:$0 sm:$0xff] }
   0x4   :  { %154 = vmatpush.bf16.msra.mxu1 %v288_v5  ;;  %v287_v7 = vld [vmem:[%s444_s3 + $0x10] sm:$0xff]  ;;  %v286_v10 = vld [vmem:[%s444_s3 + $0x8] sm:$0xff]  ;;  %v285_v12 = vld [vmem:[%s444_s3] sm:$0xff]  ;;  %vm146_vm9 = vcmask 523264   ;;  %v337_v54 = vmov 32.0   ;;  %s243_s22 = sshll.u32 %s448_s7, 4  ;;  %s244_s22 = int_to_ptr.hbm [resolvable:$true] %s243_s22 }
   0x5   :  { %v294_v43 = vld [vmem:[%s445_s4] ss:$0 sm:$0xff]  ;;  %s339_s23 = smov 128   ;;  %s340_s24 = smov 8  }
   0x6   :  { %70 = vmatpush.bf16.msra.mxu0 %v283_v1 }
   0x8   :  { %155 = vmatpush.bf16.msra.mxu1 %v287_v7 }
   0x9   :  { %263 = vmatmul.msk.bf16.vlgmr.msra.gmra.mxu0 %vm59_vm0, %v30_v4 }
   0xc   :  { %156 = vmatpush.bf16.msra.mxu1 %v286_v10 }
  0x10   :  { %157 = vmatpush.bf16.msra.mxu1 %v285_v12 }
  0x86   :  { %v72_v8 = vpop.f32.mrf.mxu0 }
  0x87   :  { %v73_v9 = vadd.f32 %v293_v6, %v72_v8 }
  0x89   :  { %v264_v11 = vmul.f32 -1.442695, %v73_v9 }
  0x8b   :  { %297 = vpow2.f32 %v264_v11 }
  0x8e   :  { %v74_v13 = vpop.f32.mrf.mxu0 }
  0x8f   :  { %v75_v14 = vadd.f32 %v293_v6, %v74_v13 }
  0x91   :  { %v298_v15 = vpop.eup %297  ;;  %v265_v16 = vmul.f32 -1.442695, %v75_v14 }
  0x92   :  { %v83_v17 = vadd.f32 1.0, %v298_v15 }
  0x93   :  { %299 = vpow2.f32 %v265_v16 }
  0x94   :  { %301 = vrcp.f32 %v83_v17  ;;  %v96_v27 = vand.u32 2147483648, %v83_v17  ;;  %vm90_vm2 = vweird.f32 %v83_v17  ;;  %v94_v28 = vand.u32 2147483647, %v83_v17 }
  0x96   :  { %v97_v34 = vor.u32 1.1754944e-38, %v96_v27  ;;  %vm95_vm5 = vcmp.eq.f32.partialorder %v94_v28, 8.507059e+37  ;;  %v296_v28 = vld [vmem:[%s447_s6] ss:$0 sm:$0xff] }
  0x99   :  { %v300_v18 = vpop.eup %299 }
  0x9a   :  { %v302_v19 = vpop.eup %301  ;;  %v84_v20 = vadd.f32 1.0, %v300_v18 }
  0x9b   :  { %v86_v21 = vmul.f32 %v302_v19, %v83_v17  ;;  %vm91_vm1 = vweird.f32 %v302_v19 }
  0x9c   :  { %303 = vrcp.f32 %v84_v20  ;;  %vm92_vm3 = vmor %vm90_vm2, %vm91_vm1  ;;  %v111_v30 = vand.u32 2147483648, %v84_v20  ;;  %v109_v33 = vand.u32 2147483647, %v84_v20  ;;  %vm105_vm6 = vweird.f32 %v84_v20 }
  0x9d   :  { %v87_v22 = vsub.f32 1.0, %v86_v21  ;;  %305 = vrcp.f32 %v337_v54 }
  0x9e   :  { %v112_v37 = vor.u32 1.1754944e-38, %v111_v30  ;;  %vm110_vm8 = vcmp.eq.f32.partialorder %v109_v33, 8.507059e+37 }
  0x9f   :  { %v88_v23 = vmul.f32 %v302_v19, %v87_v22 }
  0xa1   :  { %v89_v25 = vadd.f32 %v302_v19, %v88_v23  ;;  %v295_v23 = vld [vmem:[%s446_s5] ss:$0 sm:$0xff]  ;;  %s338_s5 = smov [#allocation2]  }
  0xa2   :  { %v304_v24 = vpop.eup %303  ;;  %s241_s20 = sshll.u32 %s338_s5, 4  ;;  %s242_s20 = int_to_ptr.vmem [resolvable:$true] %s241_s20 }
  0xa3   :  { %v101_v26 = vmul.f32 %v304_v24, %v84_v20  ;;  %v93_v31 = vsel %vm92_vm3, %v302_v19, %v89_v25  ;;  %vm106_vm4 = vweird.f32 %v304_v24  ;;  %v306_v55 = vpop.eup %305 }
  0xa4   :  { %v98_v36 = vsel %vm95_vm5, %v97_v34, %v93_v31  ;;  %vm107_vm7 = vmor %vm105_vm6, %vm106_vm4  ;;  %v173_v56 = vmul.f32 32.0, %v306_v55  ;;  %vm177_vm10 = vweird.f32 %v306_v55 }
  0xa5   :  { %v102_v29 = vsub.f32 1.0, %v101_v26  ;;  %v115_v40 = vmul.f32 %v98_v36, %v73_v9 }
  0xa6   :  { %v174_v57 = vsub.f32 1.0, %v173_v56 }
  0xa7   :  { %v103_v32 = vmul.f32 %v304_v24, %v102_v29 }
  0xa8   :  { %v175_v58 = vmul.f32 %v306_v55, %v174_v57 }
  0xa9   :  { %v104_v35 = vadd.f32 %v304_v24, %v103_v32 }
  0xaa   :  { %v176_v59 = vadd.f32 %v306_v55, %v175_v58 }
  0xab   :  { %v108_v38 = vsel %vm107_vm7, %v304_v24, %v104_v35 }
  0xac   :  { %v113_v39 = vsel %vm110_vm8, %v112_v37, %v108_v38  ;;  %v178_v60 = vsel %vm177_vm10, %v306_v55, %v176_v59 }
  0xad   :  { %v116_v41 = vmul.f32 %v113_v39, %v75_v14 }
  0xaf   :  { %v117_v42 = vpack.c.bf16 %v116_v41, %v115_v40 }
  0xb1   :  { %282 = vmatmul.msk.bf16.vlgmr.msra.gmra.mxu1 %vm146_vm9, %v117_v42 }
 0x12e   :  { %v159_v44 = vpop.f32.mrf.mxu1 }
 0x12f   :  { %v160_v45 = vadd.f32 %v294_v43, %v159_v44 }
 0x131   :  { %v166_v46 = vsel %vm59_vm0, %v160_v45, 0.0  ;;  %v181_v47 = vmul.f32 %v160_v45, %v160_v45 }
 0x132   :  { %167 = vadd.xlane.f32.xlu0 %v166_v46 }
 0x133   :  { %v183_v48 = vsel %vm59_vm0, %v181_v47, 0.0 }
 0x134   :  { %184 = vadd.xlane.f32.xlu1 %v183_v48 }
 0x136   :  { %v161_v49 = vpop.f32.mrf.mxu1 }
 0x137   :  { %v420_v50 = vadd.f32 %v294_v43, %v161_v49 }
 0x139   :  { %v169_v51 = vsel %vm59_vm0, %v420_v50, 0.0  ;;  %v182_v52 = vmul.f32 %v420_v50, %v420_v50 }
 0x13a   :  { %170 = vadd.xlane.f32.xlu0 %v169_v51 }
 0x13b   :  { %v186_v53 = vsel %vm59_vm0, %v182_v52, 0.0 }
 0x13c   :  { %187 = vadd.xlane.f32.xlu1 %v186_v53 }
 0x1a5   :  { %v168_v61 = vpop.xlane.xlu0 %167 }
 0x1a6   :  { %v179_v62 = vmul.f32 %v178_v60, %v168_v61 }
 0x1a7   :  { %v185_v63 = vpop.xlane.xlu1 %184 }
 0x1a8   :  { %v191_v0 = vmul.f32 %v179_v62, %v179_v62  ;;  %v189_v1 = vmul.f32 %v185_v63, %v178_v60  ;;  %v197_v22 = vsub.f32 %v160_v45, %v179_v62 }
 0x1aa   :  { %v193_v4 = vsub.f32 %v189_v1, %v191_v0 }
 0x1ac   :  { %v195_v5 = vmax.f32 %v193_v4, 0.0 }
 0x1ad   :  { %v171_v6 = vpop.xlane.xlu0 %170 }
 0x1ae   :  { %v199_v7 = vadd.f32 1e-05, %v195_v5  ;;  %v180_v8 = vmul.f32 %v178_v60, %v171_v6 }
 0x1af   :  { %v188_v9 = vpop.xlane.xlu1 %187 }
 0x1b0   :  { %307 = vrsqrt.f32 %v199_v7  ;;  %v192_v10 = vmul.f32 %v180_v8, %v180_v8  ;;  %v190_v11 = vmul.f32 %v188_v9, %v178_v60  ;;  %vm207_vm12 = vweird.f32 %v199_v7 }
 0x1b1   :  { %v198_v35 = vsub.f32 %v420_v50, %v180_v8 }
 0x1b2   :  { %v194_v12 = vsub.f32 %v190_v11, %v192_v10 }
 0x1b4   :  { %v196_v13 = vmax.f32 %v194_v12, 0.0 }
 0x1b6   :  { %v308_v14 = vpop.eup %307  ;;  %v200_v16 = vadd.f32 1e-05, %v196_v13 }
 0x1b7   :  { %v202_v15 = vmul.f32 %v308_v14, %v199_v7  ;;  %vm208_vm11 = vweird.f32 %v308_v14 }
 0x1b8   :  { %309 = vrsqrt.f32 %v200_v16  ;;  %vm209_vm13 = vmor %vm207_vm12, %vm208_vm11  ;;  %vm217_vm15 = vweird.f32 %v200_v16 }
 0x1b9   :  { %v203_v17 = vmul.f32 %v308_v14, %v202_v15 }
 0x1bb   :  { %v204_v18 = vmul.f32 0.5, %v203_v17 }
 0x1bd   :  { %v205_v19 = vsub.f32 1.5, %v204_v18 }
 0x1be   :  { %v310_v20 = vpop.eup %309 }
 0x1bf   :  { %v206_v21 = vmul.f32 %v308_v14, %v205_v19  ;;  %v212_v24 = vmul.f32 %v310_v20, %v200_v16  ;;  %vm218_vm14 = vweird.f32 %v310_v20 }
 0x1c0   :  { %vm219_vm1 = vmor %vm217_vm15, %vm218_vm14 }
 0x1c1   :  { %v210_v25 = vsel %vm209_vm13, %v308_v14, %v206_v21  ;;  %v213_v27 = vmul.f32 %v310_v20, %v212_v24 }
 0x1c2   :  { %v221_v26 = vmul.f32 %v210_v25, %v197_v22 }
 0x1c3   :  { %v214_v30 = vmul.f32 0.5, %v213_v27 }
 0x1c4   :  { %v226_v29 = vmul.f32 %v295_v23, %v221_v26 }
 0x1c5   :  { %v215_v31 = vsub.f32 1.5, %v214_v30 }
 0x1c6   :  { %v231_v32 = vadd.f32 %v296_v28, %v226_v29 }
 0x1c7   :  { %v216_v33 = vmul.f32 %v310_v20, %v215_v31 }
 0x1c8   :  { %v233_v34 = vadd.f32 %v231_v32, %v390_v2 }
 0x1c9   :  { %v220_v36 = vsel %vm219_vm1, %v310_v20, %v216_v33 }
 0x1ca   :  { %235 = vst.msk [vmem:[#allocation2] sm:$0xff] %vm59_vm0, %v233_v34  ;;  %v222_v37 = vmul.f32 %v220_v36, %v198_v35 }
 0x1cc   :  { %v227_v38 = vmul.f32 %v295_v23, %v222_v37 }
 0x1ce   :  { %v232_v39 = vadd.f32 %v296_v28, %v227_v38 }
 0x1d0   :  { %v234_v40 = vadd.f32 %v232_v39, %v395_v3 }
 0x1d2   :  { %236 = vst.msk [vmem:[#allocation2 + $0x8] sm:$0xff] %vm59_vm0, %v234_v40 }
 0x1d3   :  { %249 = dma.vmem_to_hbm [thread:$0]  %s242_s20, 256, %s244_s22, [#allocation3], %s339_s23, %s339_s23, %s340_s24  }
 0x1d4   :  { %335 = dma.done.wait [#allocation3], 256  }
 0x1d5   :  { %336 = vsyncadd [#allocation3], 4294967040 }
 0x1d6   :  { %254 = vsyncpa [#allocation3], 1 }

</bundles_post_ra>
